<compile_context>
chip_gen: v7x
topology: tpu7x:2x2x1
jax: 0.10.0
libtpu: 0.0.40
codegen_flags: <defaults>
</compile_context>

<pallas_src>
import math
import functools

import jax
import jax.numpy as jnp
from jax.experimental import pallas as pl
from jax.experimental.pallas import tpu as pltpu

BN_EPS = 1e-5
LANES = 128


def calculate_padding(in_size, out_size, kernel_size, stride):
    # padding so that conv output spatial size == out_size (matches the spec)
    return int(math.ceil(((out_size - 1) * stride + kernel_size - in_size) / 2))


def _round_up(x, m):
    return (x + m - 1) // m * m


def _vmem_capacity_bytes():
    try:
        return int(pltpu.get_tpu_info().vmem_capacity_bytes)
    except Exception:
        return 64 * 1024 * 1024          # conservative fallback (v7x per-TC VMEM)


def _vmem_limit_bytes(cap):
    # raise above the 16/32 MiB scoped defaults, leave headroom for Mosaic scratch
    return int(min(cap * 3 // 4, 100 * 1024 * 1024))


def _pick_k_pad(k):
    # bf16 sublane packing = 16; bump to a full 128-lane row when that fills lanes
    kp = _round_up(k, 16)
    if kp < LANES and 2 * kp >= LANES:
        kp = LANES
    return kp


def _pick_tm(m, k_pad, c_pad, vmem_cap):
    # per-step pipelined working set: double-buffered bf16 patch + bf16 conv tile,
    # resident bf16 weights + tiny stats blocks; keep under ~35% of VMEM capacity.
    budget = int(vmem_cap * 0.35)
    resident = k_pad * c_pad * 2 + 4 * 8 * c_pad * 4
    per_row = 2 * (k_pad * 2 + c_pad * 2)
    tm = (budget - resident) // max(per_row, 1)
    tm = max(128, min(tm, 2048))
    tm = (tm // 16) * 16                  # bf16 sublane-pack aligned rows
    tm = min(tm, _round_up(m, 16))
    return max(tm, 16)


# ----------------------------------------------------------------------------
# Pass 1: tiled matmul (bf16 MXU, f32 accum) + per-tile partial channel stats.
# Optionally fuses the PREVIOUS stage's BN+ReLU onto the patch rows (prologue).
# Grid axis is "parallel": each tile writes its own conv rows and its own
# partial-stat row -> megacore-shardable, no resident accumulator.
# ----------------------------------------------------------------------------
def conv_stats_kernel(p_ref, w_ref, s_ref, h_ref, conv_ref, sum_ref, sq_ref, *,
                      fuse_input_act):
    # p_ref:   (TM, K_pad)        bf16 im2col patch tile
    # w_ref:   (K_pad, C_pad)     bf16 conv weight (resident)
    # s_ref/h_ref: (1, K_pad)     f32 per-tap scale/shift of the previous BN (may be unused)
    # conv_ref:(TM, C_pad)        bf16 conv output tile
    # sum_ref/sq_ref: (1, 8, C_pad) f32 per-tile partial sums (8 sublane partials)
    p = p_ref[...]
    if fuse_input_act:
        pf = p.astype(jnp.float32) * s_ref[...] + h_ref[...]
        p = jnp.maximum(pf, 0.0).astype(jnp.bfloat16)
    acc = jnp.dot(p, w_ref[...], preferred_element_type=jnp.float32)
    conv_ref[...] = acc.astype(conv_ref.dtype)
    tm, c_pad = acc.shape
    acc3 = acc.reshape(tm // 8, 8, c_pad)           # layout-native vreg decomposition
    sum_ref[0] = jnp.sum(acc3, axis=0)
    sq_ref[0] = jnp.sum(acc3 * acc3, axis=0)


# ----------------------------------------------------------------------------
# Final pass only: BN (precomputed scale/shift) + ReLU, parallel over M tiles.
# ----------------------------------------------------------------------------
def bn_relu_kernel(conv_ref, s_ref, h_ref, o_ref):
    x = conv_ref[...].astype(jnp.float32)
    o_ref[...] = jnp.maximum(x * s_ref[...] + h_ref[...], 0.0)


# ----------------------------------------------------------------------------
# One conv stage: tiled Pallas matmul + stats, then tiny plain-JAX finalize of
# the per-channel BN affine (mean/var from global batch stats, var clamped >=0).
# ----------------------------------------------------------------------------
def conv_bn_stats_stage(patches, w2d, gamma, beta, *,
                        in_scale_tap=None, in_shift_tap=None, in_pad_tap=None):
    M, K = patches.shape
    Cout = w2d.shape[1]
    fuse = in_scale_tap is not None

    K_pad = _pick_k_pad(K)
    C_pad = _round_up(Cout, LANES)
    vmem_cap = _vmem_capacity_bytes()
    TM = _pick_tm(M, K_pad, C_pad, vmem_cap)
    M_pad = _round_up(M, TM)
    n_tiles = M_pad // TM
    vmem_limit = _vmem_limit_bytes(vmem_cap)

    # bf16 patch matrix.  Rows/cols beyond (M, K) are filled with a value the
    # (optional) fused activation maps to exactly 0, so padded rows contribute
    # nothing to the matmul nor to the batch statistics.
    if fuse:
        row_fill = jnp.zeros((K_pad,), jnp.bfloat16).at[:K].set(
            in_pad_tap.astype(jnp.bfloat16))
    else:
        row_fill = jnp.zeros((K_pad,), jnp.bfloat16)
    p = (jnp.zeros((M_pad, K_pad), jnp.bfloat16) + row_fill[None, :]
         ).at[:M, :K].set(patches.astype(jnp.bfloat16))
    w = jnp.zeros((K_pad, C_pad), jnp.bfloat16).at[:K, :Cout].set(
        w2d.astype(jnp.bfloat16))

    s_tap = jnp.zeros((1, K_pad), jnp.float32)
    h_tap = jnp.zeros((1, K_pad), jnp.float32)
    if fuse:
        s_tap = s_tap.at[0, :K].set(in_scale_tap)
        h_tap = h_tap.at[0, :K].set(in_shift_tap)

    conv, psum, psq = pl.pallas_call(
        functools.partial(conv_stats_kernel, fuse_input_act=fuse),
        out_shape=(
            jax.ShapeDtypeStruct((M_pad, C_pad), jnp.bfloat16),
            jax.ShapeDtypeStruct((n_tiles, 8, C_pad), jnp.float32),
            jax.ShapeDtypeStruct((n_tiles, 8, C_pad), jnp.float32),
        ),
        grid=(n_tiles,),
        in_specs=[
            pl.BlockSpec((TM, K_pad), lambda i: (i, 0)),
            pl.BlockSpec((K_pad, C_pad), lambda i: (0, 0)),
            pl.BlockSpec((1, K_pad), lambda i: (0, 0)),
            pl.BlockSpec((1, K_pad), lambda i: (0, 0)),
        ],
        out_specs=(
            pl.BlockSpec((TM, C_pad), lambda i: (i, 0)),
            pl.BlockSpec((1, 8, C_pad), lambda i: (i, 0, 0)),   # per-tile partials
            pl.BlockSpec((1, 8, C_pad), lambda i: (i, 0, 0)),
        ),
        compiler_params=pltpu.CompilerParams(
            dimension_semantics=("parallel",),           # no resident acc -> megacore-safe
            vmem_limit_bytes=vmem_limit),
    )(p, w, s_tap, h_tap)

    # Tiny cross-tile reduction + BN affine precompute (plain JAX, f32).
    csum = jnp.sum(psum, axis=(0, 1))[:Cout]
    csq = jnp.sum(psq, axis=(0, 1))[:Cout]
    inv_count = 1.0 / float(M)
    mean = csum * inv_count
    var = jnp.maximum(csq * inv_count - mean * mean, 0.0)   # clamp: E[x^2]-E[x]^2 can dip <0
    scale = gamma * jax.lax.rsqrt(var + BN_EPS)
    shift = beta - mean * scale

    meta = (M, Cout, C_pad, TM, M_pad, n_tiles, vmem_limit)
    return conv, scale, shift, meta


def bn_relu_pass(conv_padded, scale, shift, meta):
    M, Cout, C_pad, TM, M_pad, n_tiles, vmem_limit = meta
    s = jnp.zeros((1, C_pad), jnp.float32).at[0, :Cout].set(scale)
    h = jnp.zeros((1, C_pad), jnp.float32).at[0, :Cout].set(shift)
    y = pl.pallas_call(
        bn_relu_kernel,
        out_shape=jax.ShapeDtypeStruct((M_pad, C_pad), jnp.float32),
        grid=(n_tiles,),
        in_specs=[
            pl.BlockSpec((TM, C_pad), lambda i: (i, 0)),
            pl.BlockSpec((1, C_pad), lambda i: (0, 0)),
            pl.BlockSpec((1, C_pad), lambda i: (0, 0)),
        ],
        out_specs=pl.BlockSpec((TM, C_pad), lambda i: (i, 0)),
        compiler_params=pltpu.CompilerParams(
            dimension_semantics=("parallel",), vmem_limit_bytes=vmem_limit),
    )(conv_padded, s, h)
    return y[:M, :Cout]


# ----------------------------------------------------------------------------
# Glue: bf16 im2col (NHWC), weight reshaping, NCHW <-> NHWC conversion
# ----------------------------------------------------------------------------
def im2col_nhwc(x, kh, kw, stride, pad, pad_value=None):
    # x: (N, H, W, C) -> (N*OH*OW, KH*KW*C); patch flat order = (kh, kw, C).
    # pad_value: optional per-channel (C,) border fill (else zeros).
    N, H, W, C = x.shape
    if pad > 0:
        if pad_value is None:
            x = jnp.pad(x, ((0, 0), (pad, pad), (pad, pad), (0, 0)))
        else:
            hp, wp = H + 2 * pad, W + 2 * pad
            base = jnp.zeros((N, hp, wp, C), x.dtype) + pad_value.astype(x.dtype)
            x = base.at[:, pad:pad + H, pad:pad + W, :].set(x)
    Hp, Wp = x.shape[1], x.shape[2]
    oh = (Hp - kh) // stride + 1
    ow = (Wp - kw) // stride + 1
    cols = []
    for i in range(kh):
        for j in range(kw):
            cols.append(x[:, i:i + stride * oh:stride, j:j + stride * ow:stride, :])
    patches = jnp.stack(cols, axis=3)               # (N, OH, OW, KH*KW, C)
    return patches.reshape(N * oh * ow, kh * kw * C), (N, oh, ow)


def conv_weight_to_2d(w_oihw):
    # PyTorch weight (Cout, Cin, KH, KW) -> (KH*KW*Cin, Cout), matching im2col order
    cout, cin, kh, kw = w_oihw.shape
    return jnp.transpose(w_oihw, (2, 3, 1, 0)).reshape(kh * kw * cin, cout)


def down_block_forward(x_nchw, params, input_size, kernel_size):
    # x_nchw: (N, Cin, H, W), H == W == input_size.  Public interface stays NCHW.
    k = kernel_size
    half = input_size // 2
    pad1 = calculate_padding(input_size, half, k, 2)
    pad2 = calculate_padding(half, half, k, 1)

    x = jnp.transpose(x_nchw, (0, 2, 3, 1)).astype(jnp.bfloat16)   # NHWC, bf16

    # ---- stage 1: conv(stride 2) + batch stats.  Its BN+ReLU is deferred and
    # fused into stage 2's matmul prologue.  Conv biases b1/b2 are dropped: a
    # per-channel constant cancels exactly under training-mode BatchNorm.
    p1, (n, oh, ow) = im2col_nhwc(x, k, k, stride=2, pad=pad1)
    w1 = conv_weight_to_2d(params["w1"])
    z1, scale1, shift1, meta1 = conv_bn_stats_stage(
        p1, w1, params["g1"], params["beta1"])
    M1, Cout1 = meta1[0], meta1[1]
    z1 = z1[:M1, :Cout1].reshape(n, oh, ow, Cout1)          # pre-activation, bf16

    # Per-channel pad value v with relu(v*scale1+shift1) == 0 (robust to bf16
    # rounding via a small negative margin), so conv2's zero-padding of the
    # post-activation map is reproduced exactly from the pre-activation map.
    # TODO(synk): if gamma1 == 0 for a channel this padding is only approximate.
    margin = 0.01 * jnp.abs(shift1) + 1e-6
    safe = jnp.where(scale1 == 0.0, 1.0, scale1)
    pad_val1 = jnp.where(scale1 == 0.0, 0.0, -(shift1 + margin) / safe)

    # ---- stage 2: fused [BN1+ReLU1] -> conv(stride 1) + stats -> BN2+ReLU2.
    p2, (n2, oh2, ow2) = im2col_nhwc(z1, k, k, stride=1, pad=pad2,
                                     pad_value=pad_val1)
    w2 = conv_weight_to_2d(params["w2"])
    kk = k * k
    z2, scale2, shift2, meta2 = conv_bn_stats_stage(
        p2, w2, params["g2"], params["beta2"],
        in_scale_tap=jnp.tile(scale1, kk),
        in_shift_tap=jnp.tile(shift1, kk),
        in_pad_tap=jnp.tile(pad_val1, kk))

    y2 = bn_relu_pass(z2, scale2, shift2, meta2)            # final BN+ReLU, f32
    y2 = y2.reshape(n2, oh2, ow2, -1)
    return jnp.transpose(y2, (0, 3, 1, 2))                  # back to NCHW


# ----------------------------------------------------------------------------
# Pure-JAX f32 reference (PyTorch semantics, training-mode BN, with conv biases)
# ----------------------------------------------------------------------------
def reference_forward(x, params, input_size, kernel_size):
    k = kernel_size
    half = input_size // 2
    pad1 = calculate_padding(input_size, half, k, 2)
    pad2 = calculate_padding(half, half, k, 1)

    def conv(x, w, b, stride, pad):
        y = jax.lax.conv_general_dilated(
            x, w, (stride, stride), [(pad, pad), (pad, pad)],
            dimension_numbers=("NCHW", "OIHW", "NCHW"))
        return y + b[None, :, None, None]

    def bn_relu(y, g, beta):
        mean = y.mean(axis=(0, 2, 3), keepdims=True)
        var = y.var(axis=(0, 2, 3), keepdims=True)           # biased, like PyTorch fwd
        yn = (y - mean) * jax.lax.rsqrt(var + BN_EPS)
        return jnp.maximum(yn * g[None, :, None, None] + beta[None, :, None, None], 0.0)

    y = bn_relu(conv(x, params["w1"], params["b1"], 2, pad1), params["g1"], params["beta1"])
    y = bn_relu(conv(y, params["w2"], params["b2"], 1, pad2), params["g2"], params["beta2"])
    return y


# ----------------------------------------------------------------------------
# main
# ----------------------------------------------------------------------------
if __name__ == "__main__":
    N, Cin, Cout, S, K = 2, 4, 8, 16, 3

    key = jax.random.PRNGKey(0)
    k_x, k_w1, k_b1, k_w2, k_b2, k_g1, k_be1, k_g2, k_be2 = jax.random.split(key, 9)

    x = jax.random.normal(k_x, (N, Cin, S, S), dtype=jnp.float32)

    params = {
        "w1": jax.random.normal(k_w1, (Cout, Cin, K, K), jnp.float32) * 0.1,
        "b1": jax.random.normal(k_b1, (Cout,), jnp.float32) * 0.1,   # cancels under BN
        "g1": 1.0 + 0.1 * jax.random.normal(k_g1, (Cout,), jnp.float32),
        "beta1": 0.1 * jax.random.normal(k_be1, (Cout,), jnp.float32),
        "w2": jax.random.normal(k_w2, (Cout, Cout, K, K), jnp.float32) * 0.1,
        "b2": jax.random.normal(k_b2, (Cout,), jnp.float32) * 0.1,   # cancels under BN
        "g2": 1.0 + 0.1 * jax.random.normal(k_g2, (Cout,), jnp.float32),
        "beta2": 0.1 * jax.random.normal(k_be2, (Cout,), jnp.float32),
    }

    fwd = jax.jit(functools.partial(down_block_forward,
                                    input_size=S, kernel_size=K))
    out = jax.block_until_ready(fwd(x, params))
    ref = jax.block_until_ready(reference_forward(x, params, S, K))

    assert out.shape == (N, Cout, S // 2, S // 2), out.shape
    assert bool(jnp.all(out >= 0.0))                 # ReLU output
    assert bool(jnp.all(jnp.isfinite(out)))
    # bf16 MXU / bf16 intermediates vs f32 reference -> loose tolerance
    max_err = float(jnp.max(jnp.abs(out - ref)))
    assert max_err < 0.15, max_err
    print("KERNEL_OK")
</pallas_src>

<mosaic_0001>
module attributes {stable_mosaic.version = 11 : i64} {
  func.func @conv_stats_kernel(%arg0: i32, %arg1: memref<128x48xbf16, #tpu.memory_space<vmem>>, %arg2: memref<48x128xbf16, #tpu.memory_space<vmem>>, %arg3: memref<1x48xf32, #tpu.memory_space<vmem>>, %arg4: memref<1x48xf32, #tpu.memory_space<vmem>>, %arg5: memref<128x128xbf16, #tpu.memory_space<vmem>>, %arg6: memref<1x8x128xf32, #tpu.memory_space<vmem>>, %arg7: memref<1x8x128xf32, #tpu.memory_space<vmem>>) attributes {dimension_semantics = [#tpu.dimension_semantics<parallel>], iteration_bounds = array<i64: 1>, scalar_prefetch = 0 : i64, scratch_operands = 0 : i64, tpu.core_type = #tpu.core_type<tc>, window_params = [{transform_indices = @transform_0, window_bounds = array<i64: 128, 48>}, {pipeline_mode = #tpu.pipeline_mode<synchronous>, transform_indices = @transform_1, window_bounds = array<i64: 48, 128>}, {pipeline_mode = #tpu.pipeline_mode<synchronous>, transform_indices = @transform_2, window_bounds = array<i64: 1, 48>}, {pipeline_mode = #tpu.pipeline_mode<synchronous>, transform_indices = @transform_3, window_bounds = array<i64: 1, 48>}, {transform_indices = @transform_4, window_bounds = array<i64: 128, 128>}, {transform_indices = @transform_5, window_bounds = array<i64: 1, 8, 128>}, {transform_indices = @transform_6, window_bounds = array<i64: 1, 8, 128>}]} {
    %c0 = arith.constant 0 : index
    %c0_0 = arith.constant 0 : index
    %0 = vector.load %arg1[%c0, %c0_0] : memref<128x48xbf16, #tpu.memory_space<vmem>>, vector<128x48xbf16>
    %c0_1 = arith.constant 0 : index
    %c0_2 = arith.constant 0 : index
    %1 = vector.load %arg2[%c0_1, %c0_2] : memref<48x128xbf16, #tpu.memory_space<vmem>>, vector<48x128xbf16>
    %cst = arith.constant dense<0.000000e+00> : vector<128x128xf32>
    %2 = tpu.matmul %0, %1, %cst {dimension_numbers = #tpu.dot_dimension_numbers<[1], [0], [0], [1], [0, 0, 1, 1], [], []>} : vector<128x48xbf16>, vector<48x128xbf16>, vector<128x128xf32> -> vector<128x128xf32>
    %3 = arith.truncf %2 : vector<128x128xf32> to vector<128x128xbf16>
    %c0_3 = arith.constant 0 : index
    %c0_4 = arith.constant 0 : index
    %4 = vector.load %arg5[%c0_3, %c0_4] : memref<128x128xbf16, #tpu.memory_space<vmem>>, vector<128x128xbf16>
    tpu.vector_store %arg5[%c0_3, %c0_4], %3 {strides = array<i32>} : memref<128x128xbf16, #tpu.memory_space<vmem>>, vector<128x128xbf16>,
    %5 = vector.shape_cast %2 : vector<128x128xf32> to vector<16x8x128xf32>
    %cst_5 = arith.constant dense<0.000000e+00> : vector<8x128xf32>
    %6 = vector.multi_reduction <add>, %5, %cst_5 [0] : vector<16x8x128xf32> to vector<8x128xf32>
    %c0_6 = arith.constant 0 : index
    %c0_7 = arith.constant 0 : index
    %c0_8 = arith.constant 0 : index
    %7 = vector.load %arg6[%c0_6, %c0_7, %c0_8] : memref<1x8x128xf32, #tpu.memory_space<vmem>>, vector<1x8x128xf32>
    %8 = vector.shape_cast %7 : vector<1x8x128xf32> to vector<8x128xf32>
    %9 = vector.shape_cast %6 : vector<8x128xf32> to vector<1x8x128xf32>
    tpu.vector_store %arg6[%c0_6, %c0_7, %c0_8], %9 {strides = array<i32>} : memref<1x8x128xf32, #tpu.memory_space<vmem>>, vector<1x8x128xf32>,
    %10 = arith.mulf %5, %5 : vector<16x8x128xf32>
    %cst_9 = arith.constant dense<0.000000e+00> : vector<8x128xf32>
    %11 = vector.multi_reduction <add>, %10, %cst_9 [0] : vector<16x8x128xf32> to vector<8x128xf32>
    %c0_10 = arith.constant 0 : index
    %c0_11 = arith.constant 0 : index
    %c0_12 = arith.constant 0 : index
    %12 = vector.load %arg7[%c0_10, %c0_11, %c0_12] : memref<1x8x128xf32, #tpu.memory_space<vmem>>, vector<1x8x128xf32>
    %13 = vector.shape_cast %12 : vector<1x8x128xf32> to vector<8x128xf32>
    %14 = vector.shape_cast %11 : vector<8x128xf32> to vector<1x8x128xf32>
    tpu.vector_store %arg7[%c0_10, %c0_11, %c0_12], %14 {strides = array<i32>} : memref<1x8x128xf32, #tpu.memory_space<vmem>>, vector<1x8x128xf32>,
    return
  }
  func.func @transform_0(%arg0: i32) -> (i32, i32) {
    %c0_i32 = arith.constant 0 : i32
    %c0_i32_0 = arith.constant 0 : i32
    return %arg0, %c0_i32 : i32, i32
  }
  func.func @transform_1(%arg0: i32) -> (i32, i32) {
    %c0_i32 = arith.constant 0 : i32
    %c0_i32_0 = arith.constant 0 : i32
    %c0_i32_1 = arith.constant 0 : i32
    return %c0_i32, %c0_i32_0 : i32, i32
  }
  func.func @transform_2(%arg0: i32) -> (i32, i32) {
    %c0_i32 = arith.constant 0 : i32
    %c0_i32_0 = arith.constant 0 : i32
    %c0_i32_1 = arith.constant 0 : i32
    return %c0_i32, %c0_i32_0 : i32, i32
  }
  func.func @transform_3(%arg0: i32) -> (i32, i32) {
    %c0_i32 = arith.constant 0 : i32
    %c0_i32_0 = arith.constant 0 : i32
    %c0_i32_1 = arith.constant 0 : i32
    return %c0_i32, %c0_i32_0 : i32, i32
  }
  func.func @transform_4(%arg0: i32) -> (i32, i32) {
    %c0_i32 = arith.constant 0 : i32
    %c0_i32_0 = arith.constant 0 : i32
    return %arg0, %c0_i32 : i32, i32
  }
  func.func @transform_5(%arg0: i32) -> (i32, i32, i32) {
    %c0_i32 = arith.constant 0 : i32
    %c0_i32_0 = arith.constant 0 : i32
    %c0_i32_1 = arith.constant 0 : i32
    return %arg0, %c0_i32, %c0_i32_0 : i32, i32, i32
  }
  func.func @transform_6(%arg0: i32) -> (i32, i32, i32) {
    %c0_i32 = arith.constant 0 : i32
    %c0_i32_0 = arith.constant 0 : i32
    %c0_i32_1 = arith.constant 0 : i32
    return %arg0, %c0_i32, %c0_i32_0 : i32, i32, i32
  }
}

module attributes {stable_mosaic.version = 11 : i64} {
  func.func @conv_stats_kernel(%arg0: i32, %arg1: memref<128x128xbf16, #tpu.memory_space<vmem>>, %arg2: memref<128x128xbf16, #tpu.memory_space<vmem>>, %arg3: memref<1x128xf32, #tpu.memory_space<vmem>>, %arg4: memref<1x128xf32, #tpu.memory_space<vmem>>, %arg5: memref<128x128xbf16, #tpu.memory_space<vmem>>, %arg6: memref<1x8x128xf32, #tpu.memory_space<vmem>>, %arg7: memref<1x8x128xf32, #tpu.memory_space<vmem>>) attributes {dimension_semantics = [#tpu.dimension_semantics<parallel>], iteration_bounds = array<i64: 1>, scalar_prefetch = 0 : i64, scratch_operands = 0 : i64, tpu.core_type = #tpu.core_type<tc>, window_params = [{transform_indices = @transform_0, window_bounds = array<i64: 128, 128>}, {pipeline_mode = #tpu.pipeline_mode<synchronous>, transform_indices = @transform_1, window_bounds = array<i64: 128, 128>}, {pipeline_mode = #tpu.pipeline_mode<synchronous>, transform_indices = @transform_2, window_bounds = array<i64: 1, 128>}, {pipeline_mode = #tpu.pipeline_mode<synchronous>, transform_indices = @transform_3, window_bounds = array<i64: 1, 128>}, {transform_indices = @transform_4, window_bounds = array<i64: 128, 128>}, {transform_indices = @transform_5, window_bounds = array<i64: 1, 8, 128>}, {transform_indices = @transform_6, window_bounds = array<i64: 1, 8, 128>}]} {
    %c0 = arith.constant 0 : index
    %c0_0 = arith.constant 0 : index
    %0 = vector.load %arg1[%c0, %c0_0] : memref<128x128xbf16, #tpu.memory_space<vmem>>, vector<128x128xbf16>
    %1 = arith.extf %0 : vector<128x128xbf16> to vector<128x128xf32>
    %c0_1 = arith.constant 0 : index
    %c0_2 = arith.constant 0 : index
    %2 = vector.load %arg3[%c0_1, %c0_2] : memref<1x128xf32, #tpu.memory_space<vmem>>, vector<1x128xf32>
    %3 = vector.broadcast %2 : vector<1x128xf32> to vector<128x128xf32>
    %4 = arith.mulf %1, %3 : vector<128x128xf32>
    %c0_3 = arith.constant 0 : index
    %c0_4 = arith.constant 0 : index
    %5 = vector.load %arg4[%c0_3, %c0_4] : memref<1x128xf32, #tpu.memory_space<vmem>>, vector<1x128xf32>
    %6 = vector.broadcast %5 : vector<1x128xf32> to vector<128x128xf32>
    %7 = arith.addf %4, %6 : vector<128x128xf32>
    %cst = arith.constant 0.000000e+00 : f32
    %8 = vector.broadcast %cst : f32 to vector<128x128xf32>
    %9 = arith.maximumf %7, %8 : vector<128x128xf32>
    %10 = arith.truncf %9 : vector<128x128xf32> to vector<128x128xbf16>
    %c0_5 = arith.constant 0 : index
    %c0_6 = arith.constant 0 : index
    %11 = vector.load %arg2[%c0_5, %c0_6] : memref<128x128xbf16, #tpu.memory_space<vmem>>, vector<128x128xbf16>
    %cst_7 = arith.constant dense<0.000000e+00> : vector<128x128xf32>
    %12 = tpu.matmul %10, %11, %cst_7 {dimension_numbers = #tpu.dot_dimension_numbers<[1], [0], [0], [1], [0, 0, 1, 1], [], []>} : vector<128x128xbf16>, vector<128x128xbf16>, vector<128x128xf32> -> vector<128x128xf32>
    %13 = arith.truncf %12 : vector<128x128xf32> to vector<128x128xbf16>
    %c0_8 = arith.constant 0 : index
    %c0_9 = arith.constant 0 : index
    %14 = vector.load %arg5[%c0_8, %c0_9] : memref<128x128xbf16, #tpu.memory_space<vmem>>, vector<128x128xbf16>
    tpu.vector_store %arg5[%c0_8, %c0_9], %13 {strides = array<i32>} : memref<128x128xbf16, #tpu.memory_space<vmem>>, vector<128x128xbf16>,
    %15 = vector.shape_cast %12 : vector<128x128xf32> to vector<16x8x128xf32>
    %cst_10 = arith.constant dense<0.000000e+00> : vector<8x128xf32>
    %16 = vector.multi_reduction <add>, %15, %cst_10 [0] : vector<16x8x128xf32> to vector<8x128xf32>
    %c0_11 = arith.constant 0 : index
    %c0_12 = arith.constant 0 : index
    %c0_13 = arith.constant 0 : index
    %17 = vector.load %arg6[%c0_11, %c0_12, %c0_13] : memref<1x8x128xf32, #tpu.memory_space<vmem>>, vector<1x8x128xf32>
    %18 = vector.shape_cast %17 : vector<1x8x128xf32> to vector<8x128xf32>
    %19 = vector.shape_cast %16 : vector<8x128xf32> to vector<1x8x128xf32>
    tpu.vector_store %arg6[%c0_11, %c0_12, %c0_13], %19 {strides = array<i32>} : memref<1x8x128xf32, #tpu.memory_space<vmem>>, vector<1x8x128xf32>,
    %20 = arith.mulf %15, %15 : vector<16x8x128xf32>
    %cst_14 = arith.constant dense<0.000000e+00> : vector<8x128xf32>
    %21 = vector.multi_reduction <add>, %20, %cst_14 [0] : vector<16x8x128xf32> to vector<8x128xf32>
    %c0_15 = arith.constant 0 : index
    %c0_16 = arith.constant 0 : index
    %c0_17 = arith.constant 0 : index
    %22 = vector.load %arg7[%c0_15, %c0_16, %c0_17] : memref<1x8x128xf32, #tpu.memory_space<vmem>>, vector<1x8x128xf32>
    %23 = vector.shape_cast %22 : vector<1x8x128xf32> to vector<8x128xf32>
    %24 = vector.shape_cast %21 : vector<8x128xf32> to vector<1x8x128xf32>
    tpu.vector_store %arg7[%c0_15, %c0_16, %c0_17], %24 {strides = array<i32>} : memref<1x8x128xf32, #tpu.memory_space<vmem>>, vector<1x8x128xf32>,
    return
  }
  func.func @transform_0(%arg0: i32) -> (i32, i32) {
    %c0_i32 = arith.constant 0 : i32
    %c0_i32_0 = arith.constant 0 : i32
    return %arg0, %c0_i32 : i32, i32
  }
  func.func @transform_1(%arg0: i32) -> (i32, i32) {
    %c0_i32 = arith.constant 0 : i32
    %c0_i32_0 = arith.constant 0 : i32
    %c0_i32_1 = arith.constant 0 : i32
    return %c0_i32, %c0_i32_0 : i32, i32
  }
  func.func @transform_2(%arg0: i32) -> (i32, i32) {
    %c0_i32 = arith.constant 0 : i32
    %c0_i32_0 = arith.constant 0 : i32
    %c0_i32_1 = arith.constant 0 : i32
    return %c0_i32, %c0_i32_0 : i32, i32
  }
  func.func @transform_3(%arg0: i32) -> (i32, i32) {
    %c0_i32 = arith.constant 0 : i32
    %c0_i32_0 = arith.constant 0 : i32
    %c0_i32_1 = arith.constant 0 : i32
    return %c0_i32, %c0_i32_0 : i32, i32
  }
  func.func @transform_4(%arg0: i32) -> (i32, i32) {
    %c0_i32 = arith.constant 0 : i32
    %c0_i32_0 = arith.constant 0 : i32
    return %arg0, %c0_i32 : i32, i32
  }
  func.func @transform_5(%arg0: i32) -> (i32, i32, i32) {
    %c0_i32 = arith.constant 0 : i32
    %c0_i32_0 = arith.constant 0 : i32
    %c0_i32_1 = arith.constant 0 : i32
    return %arg0, %c0_i32, %c0_i32_0 : i32, i32, i32
  }
  func.func @transform_6(%arg0: i32) -> (i32, i32, i32) {
    %c0_i32 = arith.constant 0 : i32
    %c0_i32_0 = arith.constant 0 : i32
    %c0_i32_1 = arith.constant 0 : i32
    return %arg0, %c0_i32, %c0_i32_0 : i32, i32, i32
  }
}

module attributes {stable_mosaic.version = 11 : i64} {
  func.func @bn_relu_kernel(%arg0: i32, %arg1: memref<128x128xbf16, #tpu.memory_space<vmem>>, %arg2: memref<1x128xf32, #tpu.memory_space<vmem>>, %arg3: memref<1x128xf32, #tpu.memory_space<vmem>>, %arg4: memref<128x128xf32, #tpu.memory_space<vmem>>) attributes {dimension_semantics = [#tpu.dimension_semantics<parallel>], iteration_bounds = array<i64: 1>, scalar_prefetch = 0 : i64, scratch_operands = 0 : i64, tpu.core_type = #tpu.core_type<tc>, window_params = [{transform_indices = @transform_0, window_bounds = array<i64: 128, 128>}, {pipeline_mode = #tpu.pipeline_mode<synchronous>, transform_indices = @transform_1, window_bounds = array<i64: 1, 128>}, {pipeline_mode = #tpu.pipeline_mode<synchronous>, transform_indices = @transform_2, window_bounds = array<i64: 1, 128>}, {transform_indices = @transform_3, window_bounds = array<i64: 128, 128>}]} {
    %c0 = arith.constant 0 : index
    %c0_0 = arith.constant 0 : index
    %0 = vector.load %arg1[%c0, %c0_0] : memref<128x128xbf16, #tpu.memory_space<vmem>>, vector<128x128xbf16>
    %1 = arith.extf %0 : vector<128x128xbf16> to vector<128x128xf32>
    %c0_1 = arith.constant 0 : index
    %c0_2 = arith.constant 0 : index
    %2 = vector.load %arg2[%c0_1, %c0_2] : memref<1x128xf32, #tpu.memory_space<vmem>>, vector<1x128xf32>
    %3 = vector.broadcast %2 : vector<1x128xf32> to vector<128x128xf32>
    %4 = arith.mulf %1, %3 : vector<128x128xf32>
    %c0_3 = arith.constant 0 : index
    %c0_4 = arith.constant 0 : index
    %5 = vector.load %arg3[%c0_3, %c0_4] : memref<1x128xf32, #tpu.memory_space<vmem>>, vector<1x128xf32>
    %6 = vector.broadcast %5 : vector<1x128xf32> to vector<128x128xf32>
    %7 = arith.addf %4, %6 : vector<128x128xf32>
    %cst = arith.constant 0.000000e+00 : f32
    %8 = vector.broadcast %cst : f32 to vector<128x128xf32>
    %9 = arith.maximumf %7, %8 : vector<128x128xf32>
    %c0_5 = arith.constant 0 : index
    %c0_6 = arith.constant 0 : index
    %10 = vector.load %arg4[%c0_5, %c0_6] : memref<128x128xf32, #tpu.memory_space<vmem>>, vector<128x128xf32>
    tpu.vector_store %arg4[%c0_5, %c0_6], %9 {strides = array<i32>} : memref<128x128xf32, #tpu.memory_space<vmem>>, vector<128x128xf32>,
    return
  }
  func.func @transform_0(%arg0: i32) -> (i32, i32) {
    %c0_i32 = arith.constant 0 : i32
    %c0_i32_0 = arith.constant 0 : i32
    return %arg0, %c0_i32 : i32, i32
  }
  func.func @transform_1(%arg0: i32) -> (i32, i32) {
    %c0_i32 = arith.constant 0 : i32
    %c0_i32_0 = arith.constant 0 : i32
    %c0_i32_1 = arith.constant 0 : i32
    return %c0_i32, %c0_i32_0 : i32, i32
  }
  func.func @transform_2(%arg0: i32) -> (i32, i32) {
    %c0_i32 = arith.constant 0 : i32
    %c0_i32_0 = arith.constant 0 : i32
    %c0_i32_1 = arith.constant 0 : i32
    return %c0_i32, %c0_i32_0 : i32, i32
  }
  func.func @transform_3(%arg0: i32) -> (i32, i32) {
    %c0_i32 = arith.constant 0 : i32
    %c0_i32_0 = arith.constant 0 : i32
    return %arg0, %c0_i32 : i32, i32
  }
}

</mosaic_0001>

<bundles_post_ra>
// kernel: down_block_forward.3
= control target key start
LH: loop header
LB: loop body
LE: loop exit
PB: predicated region body
PF: predicated region fallthrough
CT: control target
= control target key end

     0   :  { %vm101_vm0 = vcmask 392192   ;;  %s617_s1 = inlined_call_operand.vmem [shape: bf16[48,128], index: 1, kind: input, shape index: {}]   ;;  %s618_s2 = inlined_call_operand.vmem [shape: f32[1,48], index: 2, kind: input, shape index: {}, may-alias: {2,3}]   ;;  %s619_s3 = inlined_call_operand.vmem [shape: f32[1,48], index: 3, kind: input, shape index: {}, may-alias: {2,3}]   ;;  %s620_s0 = inlined_call_operand.vmem [shape: bf16[128,48], index: 0, kind: input, shape index: {}]   ;;  %s621_s4 = inlined_call_operand.vmem [shape: bf16[128,128], index: 4, kind: output, shape index: {0}]   ;;  %s622_s5 = inlined_call_operand.vmem [shape: f32[1,8,128], index: 5, kind: output, shape index: {1}]   ;;  %s623_s6 = inlined_call_operand.vmem [shape: f32[1,8,128], index: 6, kind: output, shape index: {2}]  }
   0x1   :  { %v500_v0 = vld [vmem:[%s617_s1] sm:$0xff]   ;;  %v501_v1 = vld [vmem:[%s617_s1 + $0x8] sm:$0xff]   ;;  %v502_v3 = vld [vmem:[%s617_s1 + $0x10] sm:$0xff]  }
   0x2   :  { %472 = vmatprep.subr.bf16.mxu0 %v500_v0  ;;  %494 = vmatprep.subr.bf16.mxu1 %v500_v0  ;;  %v503_v2 = vld [vmem:[%s620_s0] sm:$0xff]   ;;  %v504_v5 = vld [vmem:[%s620_s0 + $0x8] sm:$0xff]   ;;  %v505_v7 = vld [vmem:[%s620_s0 + $0x10] sm:$0xff]  }
   0x3   :  { %473 = vmatpush3.bf16.msra.mxu0 %v500_v0  ;;  %497 = vmatpush3.bf16.msra.mxu1 %v500_v0  ;;  %v507_v4 = vld [vmem:[%s620_s0 + $0x20] sm:$0xff]   ;;  %v508_v6 = vld [vmem:[%s620_s0 + $0x28] sm:$0xff]   ;;  %v509_v8 = vld [vmem:[%s620_s0 + $0x30] sm:$0xff]  }
   0x4   :  { %474 = vmatprep.subr.bf16.mxu0 %v501_v1  ;;  %495 = vmatprep.subr.bf16.mxu1 %v501_v1  ;;  %v506_v9 = vld [vmem:[%s620_s0 + $0x18] sm:$0xff]  }
   0x5   :  { %478 = vmatprep.mubr.msk.bf16.mxu0 %vm101_vm0, %v503_v2  ;;  %486 = vmatprep.mubr.msk.bf16.mxu1 %vm101_vm0, %v507_v4  ;;  %v510_v10 = vld [vmem:[%s620_s0 + $0x38] sm:$0xff]  }
   0x7   :  { %475 = vmatpush3.bf16.msra.mxu0 %v501_v1  ;;  %498 = vmatpush3.bf16.msra.mxu1 %v501_v1 }
   0x8   :  { %476 = vmatprep.subr.bf16.mxu0 %v502_v3  ;;  %496 = vmatprep.subr.bf16.mxu1 %v502_v3 }
   0xb   :  { %477 = vmatpush3.bf16.msra.mxu0 %v502_v3  ;;  %499 = vmatpush3.bf16.msra.mxu1 %v502_v3 }
   0xe   :  { %479 = vmatmul.mubr.msk.bf16.vlgmr.msra.gmra.mrb[0].mxu0 %vm101_vm0, %v504_v5  ;;  %487 = vmatmul.mubr.msk.bf16.vlgmr.msra.gmra.mrb[0].mxu1 %vm101_vm0, %v508_v6 }
   0xf   :  { %482 = vmatprep.mubr.msk.bf16.mxu0 %vm101_vm0, %v505_v7  ;;  %490 = vmatprep.mubr.msk.bf16.mxu1 %vm101_vm0, %v509_v8 }
  0x16   :  { %483 = vmatmul.mubr.msk.bf16.gmra.mrb[4].mxu0 %vm101_vm0, %v506_v9  ;;  %491 = vmatmul.mubr.msk.bf16.gmra.mrb[4].mxu1 %vm101_vm0, %v510_v10 }
  0xe1   :  { %v480_v11 = vpop.f32.mrb[0].mxu0  ;;  %v488_v12 = vpop.f32.mrb[0].mxu1 }
  0xe2   :  { %v160_v13 = vpop.f32.mrb[1].mxu0  ;;  %v192_v14 = vpop.f32.mrb[1].mxu1  ;;  %v321_v26 = vmul.f32 %v480_v11, %v480_v11  ;;  %v329_v62 = vmul.f32 %v488_v12, %v488_v12 }
  0xe3   :  { %v481_v15 = vpop.f32.mrb[2].mxu0  ;;  %v489_v16 = vpop.f32.mrb[2].mxu1  ;;  %v319_v17 = vmul.f32 %v160_v13, %v160_v13  ;;  %v327_v56 = vmul.f32 %v192_v14, %v192_v14 }
  0xe4   :  { %v422_v18 = vpack.c.bf16 %v481_v15, %v480_v11  ;;  %v163_v19 = vpop.f32.mrb[3].mxu0  ;;  %v442_v20 = vpack.c.bf16 %v489_v16, %v488_v12  ;;  %v195_v21 = vpop.f32.mrb[3].mxu1  ;;  %v322_v29 = vmul.f32 %v481_v15, %v481_v15  ;;  %v330_v1 = vmul.f32 %v489_v16, %v489_v16 }
  0xe5   :  { %v417_v22 = vpack.c.bf16 %v163_v19, %v160_v13  ;;  %v303_v23 = vadd.f32 %v163_v19, %v160_v13  ;;  %v320_v24 = vmul.f32 %v163_v19, %v163_v19  ;;  %v437_v25 = vpack.c.bf16 %v195_v21, %v192_v14 }
  0xe6   :  { %454 = vst [vmem:[%s621_s4 + $0x8] sm:$0xff] %v422_v18   ;;  %458 = vst [vmem:[%s621_s4 + $0x28] sm:$0xff] %v442_v20   ;;  %v328_v61 = vmul.f32 %v195_v21, %v195_v21 }
  0xe7   :  { %418 = vst [vmem:[%s621_s4] sm:$0xff] %v417_v22   ;;  %v304_v27 = vadd.f32 %v480_v11, %v303_v23  ;;  %v335_v28 = vadd.f32 %v320_v24, %v319_v17  ;;  %457 = vst [vmem:[%s621_s4 + $0x20] sm:$0xff] %v437_v25  }
  0xe9   :  { %v336_v30 = vadd.f32 %v335_v28, %v321_v26  ;;  %v484_v31 = vpop.f32.mrb[4].mxu0  ;;  %v305_v32 = vadd.f32 %v481_v15, %v304_v27  ;;  %v492_v33 = vpop.f32.mrb[4].mxu1 }
  0xea   :  { %v176_v34 = vpop.f32.mrb[5].mxu0  ;;  %v208_v35 = vpop.f32.mrb[5].mxu1  ;;  %v325_v50 = vmul.f32 %v484_v31, %v484_v31  ;;  %v333_v10 = vmul.f32 %v492_v33, %v492_v33 }
  0xeb   :  { %v306_v36 = vadd.f32 %v305_v32, %v176_v34  ;;  %v323_v37 = vmul.f32 %v176_v34, %v176_v34  ;;  %v337_v38 = vadd.f32 %v336_v30, %v322_v29  ;;  %v485_v39 = vpop.f32.mrb[6].mxu0  ;;  %v493_v40 = vpop.f32.mrb[6].mxu1  ;;  %v331_v4 = vmul.f32 %v208_v35, %v208_v35 }
  0xec   :  { %v432_v41 = vpack.c.bf16 %v485_v39, %v484_v31  ;;  %v179_v42 = vpop.f32.mrb[7].mxu0  ;;  %v452_v43 = vpack.c.bf16 %v493_v40, %v492_v33  ;;  %v211_v44 = vpop.f32.mrb[7].mxu1  ;;  %v326_v53 = vmul.f32 %v485_v39, %v485_v39 }
  0xed   :  { %v338_v45 = vadd.f32 %v337_v38, %v323_v37  ;;  %v427_v46 = vpack.c.bf16 %v179_v42, %v176_v34  ;;  %v307_v47 = vadd.f32 %v306_v36, %v179_v42  ;;  %v324_v48 = vmul.f32 %v179_v42, %v179_v42 }
  0xee   :  { %456 = vst [vmem:[%s621_s4 + $0x18] sm:$0xff] %v432_v41   ;;  %460 = vst [vmem:[%s621_s4 + $0x38] sm:$0xff] %v452_v43   ;;  %v447_v49 = vpack.c.bf16 %v211_v44, %v208_v35  ;;  %v332_v9 = vmul.f32 %v211_v44, %v211_v44 }
  0xef   :  { %455 = vst [vmem:[%s621_s4 + $0x10] sm:$0xff] %v427_v46   ;;  %v308_v51 = vadd.f32 %v484_v31, %v307_v47  ;;  %v339_v52 = vadd.f32 %v338_v45, %v324_v48 }
  0xf0   :  { %459 = vst [vmem:[%s621_s4 + $0x30] sm:$0xff] %v447_v49  }
  0xf1   :  { %v340_v54 = vadd.f32 %v339_v52, %v325_v50  ;;  %v309_v55 = vadd.f32 %v485_v39, %v308_v51 }
  0xf3   :  { %v310_v57 = vadd.f32 %v309_v55, %v192_v14  ;;  %v341_v58 = vadd.f32 %v340_v54, %v326_v53  ;;  %v334_v14 = vmul.f32 %v493_v40, %v493_v40 }
  0xf5   :  { %v342_v59 = vadd.f32 %v341_v58, %v327_v56  ;;  %v311_v60 = vadd.f32 %v310_v57, %v195_v21 }
  0xf7   :  { %v312_v63 = vadd.f32 %v488_v12, %v311_v60  ;;  %v343_v0 = vadd.f32 %v342_v59, %v328_v61 }
  0xf9   :  { %v344_v2 = vadd.f32 %v343_v0, %v329_v62  ;;  %v313_v3 = vadd.f32 %v489_v16, %v312_v63 }
  0xfb   :  { %v314_v5 = vadd.f32 %v313_v3, %v208_v35  ;;  %v345_v6 = vadd.f32 %v344_v2, %v330_v1 }
  0xfd   :  { %v346_v7 = vadd.f32 %v345_v6, %v331_v4  ;;  %v315_v8 = vadd.f32 %v314_v5, %v211_v44 }
  0xff   :  { %v316_v11 = vadd.f32 %v492_v33, %v315_v8  ;;  %v347_v13 = vadd.f32 %v346_v7, %v332_v9 }
 0x101   :  { %v317_v15 = vadd.f32 %v493_v40, %v316_v11  ;;  %v348_v17 = vadd.f32 %v347_v13, %v333_v10 }
 0x103   :  { %318 = vst [vmem:[%s622_s5] sm:$0xff] %v317_v15  ;;  %v349_v12 = vadd.f32 %v348_v17, %v334_v14 }
 0x105   :  { %350 = vst [vmem:[%s623_s6] sm:$0xff] %v349_v12 }

// kernel: down_block_forward.4
= control target key start
LH: loop header
LB: loop body
LE: loop exit
PB: predicated region body
PF: predicated region fallthrough
CT: control target
= control target key end

     0   :  { %s779_s1 = inlined_call_operand.vmem [shape: bf16[128,128], index: 1, kind: input, shape index: {}]   ;;  %s780_s0 = inlined_call_operand.vmem [shape: bf16[128,128], index: 0, kind: input, shape index: {}]   ;;  %s781_s2 = inlined_call_operand.vmem [shape: f32[1,128], index: 2, kind: input, shape index: {}]   ;;  %s782_s3 = inlined_call_operand.vmem [shape: f32[1,128], index: 3, kind: input, shape index: {}]   ;;  %s783_s4 = inlined_call_operand.vmem [shape: bf16[128,128], index: 4, kind: output, shape index: {0}]   ;;  %s784_s5 = inlined_call_operand.vmem [shape: f32[1,8,128], index: 5, kind: output, shape index: {1}]   ;;  %s785_s6 = inlined_call_operand.vmem [shape: f32[1,8,128], index: 6, kind: output, shape index: {2}]  }
   0x1   :  { %v616_v0 = vld [vmem:[%s779_s1] sm:$0xff]   ;;  %v617_v1 = vld [vmem:[%s779_s1 + $0x8] sm:$0xff]   ;;  %v618_v2 = vld [vmem:[%s779_s1 + $0x10] sm:$0xff]  }
   0x2   :  { %568 = vmatprep.subr.bf16.mxu0 %v616_v0  ;;  %600 = vmatprep.subr.bf16.mxu1 %v616_v0  ;;  %v619_v3 = vld [vmem:[%s779_s1 + $0x18] sm:$0xff]   ;;  %v467_v4 = vld [vmem:[%s780_s0] sm:$0xff]   ;;  %v538_v8 = vld [vmem:[%s780_s0 + $0x8] sm:$0xff]  }
   0x3   :  { %569 = vmatpush3.bf16.msra.mxu0 %v616_v0  ;;  %608 = vmatpush3.bf16.msra.mxu1 %v616_v0  ;;  %v677_v5 = vld [vmem:[%s781_s2] ss:$0 sm:$0xff]  ;;  %v468_v6 = vunpack.c.l.bf16 %v467_v4  ;;  %v469_v7 = vunpack.c.h.bf16 %v467_v4  ;;  %v539_v9 = vld [vmem:[%s780_s0 + $0x10] sm:$0xff]   ;;  %v472_v11 = vunpack.c.l.bf16 %v538_v8  ;;  %v473_v14 = vunpack.c.h.bf16 %v538_v8  ;;  %v540_v22 = vld [vmem:[%s780_s0 + $0x18] sm:$0xff]  }
   0x4   :  { %570 = vmatprep.subr.bf16.mxu0 %v617_v1  ;;  %601 = vmatprep.subr.bf16.mxu1 %v617_v1  ;;  %v688_v10 = vld [vmem:[%s782_s3] ss:$0 sm:$0xff]  ;;  %v476_v17 = vunpack.c.l.bf16 %v539_v9  ;;  %v477_v21 = vunpack.c.h.bf16 %v539_v9  ;;  %v542_v27 = vld [vmem:[%s780_s0 + $0x28] sm:$0xff]   ;;  %v543_v30 = vld [vmem:[%s780_s0 + $0x30] sm:$0xff]   ;;  %v480_v32 = vunpack.c.l.bf16 %v540_v22  ;;  %v481_v33 = vunpack.c.h.bf16 %v540_v22 }
   0x5   :  { %v60_v12 = vmul.f32 %v468_v6, %v677_v5  ;;  %v61_v13 = vmul.f32 %v469_v7, %v677_v5  ;;  %v541_v15 = vld [vmem:[%s780_s0 + $0x20] sm:$0xff]   ;;  %v62_v20 = vmul.f32 %v472_v11, %v677_v5  ;;  %v63_v26 = vmul.f32 %v473_v14, %v677_v5  ;;  %v621_v28 = vld [vmem:[%s779_s1 + $0x28] sm:$0xff]   ;;  %v544_v39 = vld [vmem:[%s780_s0 + $0x38] sm:$0xff]  }
   0x6   :  { %v620_v16 = vld [vmem:[%s779_s1 + $0x20] sm:$0xff]   ;;  %v484_v23 = vunpack.c.l.bf16 %v541_v15  ;;  %v64_v29 = vmul.f32 %v476_v17, %v677_v5  ;;  %v485_v34 = vunpack.c.h.bf16 %v541_v15  ;;  %v65_v36 = vmul.f32 %v477_v21, %v677_v5  ;;  %v622_v44 = vld [vmem:[%s779_s1 + $0x30] sm:$0xff]   ;;  %v623_v61 = vld [vmem:[%s779_s1 + $0x38] sm:$0xff]  }
   0x7   :  { %571 = vmatpush3.bf16.msra.mxu0 %v617_v1  ;;  %609 = vmatpush3.bf16.msra.mxu1 %v617_v1  ;;  %v83_v18 = vadd.f32 %v688_v10, %v60_v12  ;;  %v84_v19 = vadd.f32 %v688_v10, %v61_v13  ;;  %v85_v35 = vadd.f32 %v688_v10, %v62_v20  ;;  %v488_v38 = vunpack.c.l.bf16 %v542_v27 }
   0x8   :  { %572 = vmatprep.subr.bf16.mxu0 %v618_v2  ;;  %602 = vmatprep.subr.bf16.mxu1 %v618_v2  ;;  %v68_v37 = vmul.f32 %v484_v23, %v677_v5  ;;  %v86_v40 = vadd.f32 %v688_v10, %v63_v26  ;;  %v69_v41 = vmul.f32 %v485_v34, %v677_v5  ;;  %v489_v42 = vunpack.c.h.bf16 %v542_v27 }
   0x9   :  { %v99_v24 = vmax.f32 %v83_v18, 0.0  ;;  %v100_v25 = vmax.f32 %v84_v19, 0.0  ;;  %v492_v43 = vunpack.c.l.bf16 %v543_v30  ;;  %v87_v45 = vadd.f32 %v688_v10, %v64_v29 }
   0xa   :  { %v91_v46 = vadd.f32 %v688_v10, %v68_v37  ;;  %v70_v47 = vmul.f32 %v488_v38, %v677_v5  ;;  %v493_v48 = vunpack.c.h.bf16 %v543_v30  ;;  %v92_v49 = vadd.f32 %v688_v10, %v69_v41 }
   0xb   :  { %573 = vmatpush3.bf16.msra.mxu0 %v618_v2  ;;  %610 = vmatpush3.bf16.msra.mxu1 %v618_v2  ;;  %v115_v31 = vpack.c.bf16 %v100_v25, %v99_v24  ;;  %v71_v50 = vmul.f32 %v489_v42, %v677_v5  ;;  %v72_v51 = vmul.f32 %v492_v43, %v677_v5  ;;  %v496_v52 = vunpack.c.l.bf16 %v544_v39 }
   0xc   :  { %574 = vmatprep.subr.bf16.mxu0 %v619_v3  ;;  %603 = vmatprep.subr.bf16.mxu1 %v619_v3  ;;  %v107_v53 = vmax.f32 %v91_v46, 0.0  ;;  %v93_v54 = vadd.f32 %v688_v10, %v70_v47  ;;  %v73_v55 = vmul.f32 %v493_v48, %v677_v5  ;;  %v497_v56 = vunpack.c.h.bf16 %v544_v39 }
   0xd   :  { %584 = vmatprep.mubr.bf16.mxu0 %v115_v31  ;;  %v88_v57 = vadd.f32 %v688_v10, %v65_v36  ;;  %v108_v58 = vmax.f32 %v92_v49, 0.0  ;;  %v94_v59 = vadd.f32 %v688_v10, %v71_v50  ;;  %v95_v60 = vadd.f32 %v688_v10, %v72_v51 }
   0xe   :  { %v66_v62 = vmul.f32 %v480_v32, %v677_v5  ;;  %v96_v63 = vadd.f32 %v688_v10, %v73_v55  ;;  %v101_v0 = vmax.f32 %v85_v35, 0.0  ;;  %v102_v1 = vmax.f32 %v86_v40, 0.0 }
   0xf   :  { %575 = vmatpush3.bf16.msra.mxu0 %v619_v3  ;;  %611 = vmatpush3.bf16.msra.mxu1 %v619_v3  ;;  %v67_v2 = vmul.f32 %v481_v33, %v677_v5  ;;  %v119_v3 = vpack.c.bf16 %v108_v58, %v107_v53  ;;  %v109_v4 = vmax.f32 %v93_v54, 0.0  ;;  %v110_v6 = vmax.f32 %v94_v59, 0.0 }
  0x10   :  { %576 = vmatprep.subr.bf16.mxu0 %v620_v16  ;;  %604 = vmatprep.subr.bf16.mxu1 %v620_v16  ;;  %v74_v7 = vmul.f32 %v496_v52, %v677_v5  ;;  %v75_v8 = vmul.f32 %v497_v56, %v677_v5  ;;  %v103_v9 = vmax.f32 %v87_v45, 0.0  ;;  %v104_v11 = vmax.f32 %v88_v57, 0.0 }
  0x11   :  { %v111_v12 = vmax.f32 %v95_v60, 0.0  ;;  %v112_v13 = vmax.f32 %v96_v63, 0.0  ;;  %v89_v14 = vadd.f32 %v688_v10, %v66_v62  ;;  %v90_v15 = vadd.f32 %v688_v10, %v67_v2  ;;  %592 = vmatprep.mubr.bf16.mxu1 %v119_v3 }
  0x12   :  { %v120_v17 = vpack.c.bf16 %v110_v6, %v109_v4  ;;  %v97_v18 = vadd.f32 %v688_v10, %v74_v7  ;;  %v98_v19 = vadd.f32 %v688_v10, %v75_v8  ;;  %v117_v5 = vpack.c.bf16 %v104_v11, %v103_v9 }
  0x13   :  { %577 = vmatpush3.bf16.msra.mxu0 %v620_v16  ;;  %612 = vmatpush3.bf16.msra.mxu1 %v620_v16  ;;  %v116_v16 = vpack.c.bf16 %v102_v1, %v101_v0  ;;  %v121_v20 = vpack.c.bf16 %v112_v13, %v111_v12  ;;  %v105_v21 = vmax.f32 %v89_v14, 0.0  ;;  %v106_v22 = vmax.f32 %v90_v15, 0.0 }
  0x14   :  { %578 = vmatprep.subr.bf16.mxu0 %v621_v28  ;;  %605 = vmatprep.subr.bf16.mxu1 %v621_v28  ;;  %v113_v23 = vmax.f32 %v97_v18, 0.0  ;;  %v114_v24 = vmax.f32 %v98_v19, 0.0 }
  0x15   :  { %v118_v25 = vpack.c.bf16 %v106_v22, %v105_v21 }
  0x16   :  { %v122_v26 = vpack.c.bf16 %v114_v24, %v113_v23 }
  0x17   :  { %579 = vmatpush3.bf16.msra.mxu0 %v621_v28  ;;  %613 = vmatpush3.bf16.msra.mxu1 %v621_v28 }
  0x18   :  { %580 = vmatprep.subr.bf16.mxu0 %v622_v44  ;;  %606 = vmatprep.subr.bf16.mxu1 %v622_v44 }
  0x1b   :  { %581 = vmatpush3.bf16.msra.mxu0 %v622_v44  ;;  %614 = vmatpush3.bf16.msra.mxu1 %v622_v44 }
  0x1c   :  { %582 = vmatprep.subr.bf16.mxu0 %v623_v61  ;;  %607 = vmatprep.subr.bf16.mxu1 %v623_v61 }
  0x1f   :  { %583 = vmatpush3.bf16.msra.mxu0 %v623_v61  ;;  %615 = vmatpush3.bf16.msra.mxu1 %v623_v61 }
  0x22   :  { %585 = vmatmul.mubr.bf16.vlgmr.msra.gmra.mrb[0].mxu0 %v116_v16  ;;  %593 = vmatmul.mubr.bf16.vlgmr.msra.gmra.mrb[0].mxu1 %v120_v17 }
  0x23   :  { %588 = vmatprep.mubr.bf16.mxu0 %v117_v5  ;;  %596 = vmatprep.mubr.bf16.mxu1 %v121_v20 }
  0x2a   :  { %589 = vmatmul.mubr.bf16.gmra.mrb[4].mxu0 %v118_v25  ;;  %597 = vmatmul.mubr.bf16.gmra.mrb[4].mxu1 %v122_v26 }
  0xf5   :  { %v586_v27 = vpop.f32.mrb[0].mxu0  ;;  %v594_v28 = vpop.f32.mrb[0].mxu1 }
  0xf6   :  { %v221_v29 = vpop.f32.mrb[1].mxu0  ;;  %v253_v10 = vpop.f32.mrb[1].mxu1  ;;  %v382_v41 = vmul.f32 %v586_v27, %v586_v27  ;;  %v390_v15 = vmul.f32 %v594_v28, %v594_v28 }
  0xf7   :  { %v587_v30 = vpop.f32.mrb[2].mxu0  ;;  %v595_v31 = vpop.f32.mrb[2].mxu1  ;;  %v380_v32 = vmul.f32 %v221_v29, %v221_v29  ;;  %v388_v8 = vmul.f32 %v253_v10, %v253_v10 }
  0xf8   :  { %v506_v33 = vpack.c.bf16 %v587_v30, %v586_v27  ;;  %v224_v34 = vpop.f32.mrb[3].mxu0  ;;  %v526_v35 = vpack.c.bf16 %v595_v31, %v594_v28  ;;  %v256_v36 = vpop.f32.mrb[3].mxu1  ;;  %v383_v44 = vmul.f32 %v587_v30, %v587_v30  ;;  %v391_v18 = vmul.f32 %v595_v31, %v595_v31 }
  0xf9   :  { %v501_v37 = vpack.c.bf16 %v224_v34, %v221_v29  ;;  %v364_v38 = vadd.f32 %v224_v34, %v221_v29  ;;  %v381_v39 = vmul.f32 %v224_v34, %v224_v34  ;;  %v521_v40 = vpack.c.bf16 %v256_v36, %v253_v10 }
  0xfa   :  { %545 = vst [vmem:[%s783_s4 + $0x8] sm:$0xff] %v506_v33   ;;  %549 = vst [vmem:[%s783_s4 + $0x28] sm:$0xff] %v526_v35   ;;  %v389_v14 = vmul.f32 %v256_v36, %v256_v36 }
  0xfb   :  { %502 = vst [vmem:[%s783_s4] sm:$0xff] %v501_v37   ;;  %v365_v42 = vadd.f32 %v586_v27, %v364_v38  ;;  %v396_v43 = vadd.f32 %v381_v39, %v380_v32  ;;  %548 = vst [vmem:[%s783_s4 + $0x20] sm:$0xff] %v521_v40  }
  0xfd   :  { %v397_v45 = vadd.f32 %v396_v43, %v382_v41  ;;  %v590_v46 = vpop.f32.mrb[4].mxu0  ;;  %v366_v47 = vadd.f32 %v587_v30, %v365_v42  ;;  %v598_v48 = vpop.f32.mrb[4].mxu1 }
  0xfe   :  { %v237_v49 = vpop.f32.mrb[5].mxu0  ;;  %v269_v50 = vpop.f32.mrb[5].mxu1  ;;  %v386_v1 = vmul.f32 %v590_v46, %v590_v46  ;;  %v394_v26 = vmul.f32 %v598_v48, %v598_v48 }
  0xff   :  { %v367_v51 = vadd.f32 %v366_v47, %v237_v49  ;;  %v384_v52 = vmul.f32 %v237_v49, %v237_v49  ;;  %v398_v53 = vadd.f32 %v397_v45, %v383_v44  ;;  %v591_v54 = vpop.f32.mrb[6].mxu0  ;;  %v599_v55 = vpop.f32.mrb[6].mxu1  ;;  %v392_v20 = vmul.f32 %v269_v50, %v269_v50 }
 0x100   :  { %v516_v56 = vpack.c.bf16 %v591_v54, %v590_v46  ;;  %v240_v57 = vpop.f32.mrb[7].mxu0  ;;  %v536_v58 = vpack.c.bf16 %v599_v55, %v598_v48  ;;  %v272_v59 = vpop.f32.mrb[7].mxu1  ;;  %v387_v4 = vmul.f32 %v591_v54, %v591_v54 }
 0x101   :  { %v399_v60 = vadd.f32 %v398_v53, %v384_v52  ;;  %v511_v61 = vpack.c.bf16 %v240_v57, %v237_v49  ;;  %v368_v62 = vadd.f32 %v367_v51, %v240_v57  ;;  %v385_v63 = vmul.f32 %v240_v57, %v240_v57 }
 0x102   :  { %547 = vst [vmem:[%s783_s4 + $0x18] sm:$0xff] %v516_v56   ;;  %551 = vst [vmem:[%s783_s4 + $0x38] sm:$0xff] %v536_v58   ;;  %v531_v0 = vpack.c.bf16 %v272_v59, %v269_v50  ;;  %v393_v25 = vmul.f32 %v272_v59, %v272_v59 }
 0x103   :  { %546 = vst [vmem:[%s783_s4 + $0x10] sm:$0xff] %v511_v61   ;;  %v369_v2 = vadd.f32 %v590_v46, %v368_v62  ;;  %v400_v3 = vadd.f32 %v399_v60, %v385_v63 }
 0x104   :  { %550 = vst [vmem:[%s783_s4 + $0x30] sm:$0xff] %v531_v0  }
 0x105   :  { %v401_v6 = vadd.f32 %v400_v3, %v386_v1  ;;  %v370_v7 = vadd.f32 %v591_v54, %v369_v2 }
 0x107   :  { %v371_v9 = vadd.f32 %v370_v7, %v253_v10  ;;  %v402_v11 = vadd.f32 %v401_v6, %v387_v4  ;;  %v395_v10 = vmul.f32 %v599_v55, %v599_v55 }
 0x109   :  { %v403_v12 = vadd.f32 %v402_v11, %v388_v8  ;;  %v372_v13 = vadd.f32 %v371_v9, %v256_v36 }
 0x10b   :  { %v373_v16 = vadd.f32 %v594_v28, %v372_v13  ;;  %v404_v17 = vadd.f32 %v403_v12, %v389_v14 }
 0x10d   :  { %v405_v19 = vadd.f32 %v404_v17, %v390_v15  ;;  %v374_v5 = vadd.f32 %v595_v31, %v373_v16 }
 0x10f   :  { %v375_v21 = vadd.f32 %v374_v5, %v269_v50  ;;  %v406_v22 = vadd.f32 %v405_v19, %v391_v18 }
 0x111   :  { %v407_v23 = vadd.f32 %v406_v22, %v392_v20  ;;  %v376_v24 = vadd.f32 %v375_v21, %v272_v59 }
 0x113   :  { %v377_v27 = vadd.f32 %v598_v48, %v376_v24  ;;  %v408_v29 = vadd.f32 %v407_v23, %v393_v25 }
 0x115   :  { %v378_v30 = vadd.f32 %v599_v55, %v377_v27  ;;  %v409_v32 = vadd.f32 %v408_v29, %v394_v26 }
 0x117   :  { %379 = vst [vmem:[%s784_s5] sm:$0xff] %v378_v30  ;;  %v410_v28 = vadd.f32 %v409_v32, %v395_v10 }
 0x119   :  { %411 = vst [vmem:[%s785_s6] sm:$0xff] %v410_v28 }

// kernel: down_block_forward.5
= control target key start
LH: loop header
LB: loop body
LE: loop exit
PB: predicated region body
PF: predicated region fallthrough
CT: control target
= control target key end

     0   :  { %s303_s0 = inlined_call_operand.vmem [shape: bf16[128,128], index: 0, kind: input, shape index: {}]   ;;  %s304_s1 = inlined_call_operand.vmem [shape: f32[1,128], index: 1, kind: input, shape index: {}]   ;;  %s305_s2 = inlined_call_operand.vmem [shape: f32[1,128], index: 2, kind: input, shape index: {}]   ;;  %s306_s3 = inlined_call_operand.vmem [shape: f32[128,128], index: 3, kind: output, shape index: {}]  }
   0x1   :  { %v131_v0 = vld [vmem:[%s303_s0] sm:$0xff]   ;;  %v162_v4 = vld [vmem:[%s303_s0 + $0x8] sm:$0xff]   ;;  %v163_v5 = vld [vmem:[%s303_s0 + $0x10] sm:$0xff]  }
   0x2   :  { %v195_v1 = vld [vmem:[%s304_s1] ss:$0 sm:$0xff]  ;;  %v132_v2 = vunpack.c.l.bf16 %v131_v0  ;;  %v133_v3 = vunpack.c.h.bf16 %v131_v0  ;;  %v164_v6 = vld [vmem:[%s303_s0 + $0x18] sm:$0xff]   ;;  %v136_v8 = vunpack.c.l.bf16 %v162_v4  ;;  %v137_v9 = vunpack.c.h.bf16 %v162_v4  ;;  %v166_v33 = vld [vmem:[%s303_s0 + $0x28] sm:$0xff]  }
   0x3   :  { %v209_v7 = vld [vmem:[%s305_s2] ss:$0 sm:$0xff]  ;;  %v140_v10 = vunpack.c.l.bf16 %v163_v5  ;;  %v141_v11 = vunpack.c.h.bf16 %v163_v5  ;;  %v144_v14 = vunpack.c.l.bf16 %v164_v6  ;;  %v145_v15 = vunpack.c.h.bf16 %v164_v6  ;;  %v167_v34 = vld [vmem:[%s303_s0 + $0x30] sm:$0xff]   ;;  %v168_v39 = vld [vmem:[%s303_s0 + $0x38] sm:$0xff]  }
   0x4   :  { %v53_v12 = vmul.f32 %v132_v2, %v195_v1  ;;  %v54_v13 = vmul.f32 %v133_v3, %v195_v1  ;;  %v55_v16 = vmul.f32 %v136_v8, %v195_v1  ;;  %v56_v17 = vmul.f32 %v137_v9, %v195_v1  ;;  %v165_v28 = vld [vmem:[%s303_s0 + $0x20] sm:$0xff]  }
   0x5   :  { %v57_v18 = vmul.f32 %v140_v10, %v195_v1  ;;  %v58_v19 = vmul.f32 %v141_v11, %v195_v1  ;;  %v59_v22 = vmul.f32 %v144_v14, %v195_v1  ;;  %v60_v23 = vmul.f32 %v145_v15, %v195_v1 }
   0x6   :  { %v76_v20 = vadd.f32 %v209_v7, %v53_v12  ;;  %v77_v21 = vadd.f32 %v209_v7, %v54_v13  ;;  %v78_v24 = vadd.f32 %v209_v7, %v55_v16  ;;  %v79_v25 = vadd.f32 %v209_v7, %v56_v17 }
   0x7   :  { %v80_v26 = vadd.f32 %v209_v7, %v57_v18  ;;  %v81_v27 = vadd.f32 %v209_v7, %v58_v19  ;;  %v82_v31 = vadd.f32 %v209_v7, %v59_v22  ;;  %v83_v32 = vadd.f32 %v209_v7, %v60_v23 }
   0x8   :  { %v92_v29 = vmax.f32 %v76_v20, 0.0  ;;  %v93_v30 = vmax.f32 %v77_v21, 0.0  ;;  %v94_v35 = vmax.f32 %v78_v24, 0.0  ;;  %v95_v36 = vmax.f32 %v79_v25, 0.0 }
   0x9   :  { %v96_v37 = vmax.f32 %v80_v26, 0.0  ;;  %v97_v38 = vmax.f32 %v81_v27, 0.0  ;;  %v98_v40 = vmax.f32 %v82_v31, 0.0  ;;  %v99_v41 = vmax.f32 %v83_v32, 0.0 }
   0xa   :  { %108 = vst [vmem:[%s306_s3] sm:$0xff] %v92_v29  ;;  %109 = vst [vmem:[%s306_s3 + $0x8] sm:$0xff] %v93_v30  ;;  %v148_v42 = vunpack.c.l.bf16 %v165_v28  ;;  %v149_v43 = vunpack.c.h.bf16 %v165_v28  ;;  %v152_v44 = vunpack.c.l.bf16 %v166_v33  ;;  %v153_v45 = vunpack.c.h.bf16 %v166_v33 }
   0xb   :  { %110 = vst [vmem:[%s306_s3 + $0x10] sm:$0xff] %v94_v35  ;;  %111 = vst [vmem:[%s306_s3 + $0x18] sm:$0xff] %v95_v36  ;;  %v156_v46 = vunpack.c.l.bf16 %v167_v34  ;;  %v157_v47 = vunpack.c.h.bf16 %v167_v34  ;;  %v160_v50 = vunpack.c.l.bf16 %v168_v39  ;;  %v161_v51 = vunpack.c.h.bf16 %v168_v39 }
   0xc   :  { %112 = vst [vmem:[%s306_s3 + $0x20] sm:$0xff] %v96_v37  ;;  %113 = vst [vmem:[%s306_s3 + $0x28] sm:$0xff] %v97_v38  ;;  %v61_v48 = vmul.f32 %v148_v42, %v195_v1  ;;  %v62_v49 = vmul.f32 %v149_v43, %v195_v1  ;;  %v63_v52 = vmul.f32 %v152_v44, %v195_v1 }
   0xd   :  { %114 = vst [vmem:[%s306_s3 + $0x30] sm:$0xff] %v98_v40  ;;  %115 = vst [vmem:[%s306_s3 + $0x38] sm:$0xff] %v99_v41  ;;  %v64_v53 = vmul.f32 %v153_v45, %v195_v1  ;;  %v65_v54 = vmul.f32 %v156_v46, %v195_v1  ;;  %v66_v55 = vmul.f32 %v157_v47, %v195_v1 }
   0xe   :  { %v84_v56 = vadd.f32 %v209_v7, %v61_v48  ;;  %v85_v57 = vadd.f32 %v209_v7, %v62_v49  ;;  %v67_v58 = vmul.f32 %v160_v50, %v195_v1  ;;  %v68_v59 = vmul.f32 %v161_v51, %v195_v1 }
   0xf   :  { %v86_v60 = vadd.f32 %v209_v7, %v63_v52  ;;  %v87_v61 = vadd.f32 %v209_v7, %v64_v53  ;;  %v88_v62 = vadd.f32 %v209_v7, %v65_v54  ;;  %v89_v63 = vadd.f32 %v209_v7, %v66_v55 }
  0x10   :  { %v100_v0 = vmax.f32 %v84_v56, 0.0  ;;  %v101_v2 = vmax.f32 %v85_v57, 0.0  ;;  %v90_v3 = vadd.f32 %v209_v7, %v67_v58  ;;  %v91_v4 = vadd.f32 %v209_v7, %v68_v59 }
  0x11   :  { %v102_v5 = vmax.f32 %v86_v60, 0.0  ;;  %v103_v6 = vmax.f32 %v87_v61, 0.0  ;;  %v104_v8 = vmax.f32 %v88_v62, 0.0  ;;  %v105_v9 = vmax.f32 %v89_v63, 0.0 }
  0x12   :  { %116 = vst [vmem:[%s306_s3 + $0x40] sm:$0xff] %v100_v0  ;;  %117 = vst [vmem:[%s306_s3 + $0x48] sm:$0xff] %v101_v2  ;;  %v106_v1 = vmax.f32 %v90_v3, 0.0  ;;  %v107_v10 = vmax.f32 %v91_v4, 0.0 }
  0x13   :  { %118 = vst [vmem:[%s306_s3 + $0x50] sm:$0xff] %v102_v5  ;;  %119 = vst [vmem:[%s306_s3 + $0x58] sm:$0xff] %v103_v6 }
  0x14   :  { %120 = vst [vmem:[%s306_s3 + $0x60] sm:$0xff] %v104_v8  ;;  %121 = vst [vmem:[%s306_s3 + $0x68] sm:$0xff] %v105_v9 }
  0x15   :  { %122 = vst [vmem:[%s306_s3 + $0x70] sm:$0xff] %v106_v1  ;;  %123 = vst [vmem:[%s306_s3 + $0x78] sm:$0xff] %v107_v10 }

</bundles_post_ra>
